<compile_context>
chip_gen: v5e
topology: v5e:2x2
jax: 0.10.0
libtpu: 0.0.40
codegen_flags: <defaults>
</compile_context>

<pallas_src>
import math

import jax
import jax.numpy as jnp
from jax.experimental import pallas as pl
from jax.experimental.pallas import tpu as pltpu


# Per-step budget for double-buffered tiles, sized against v7x's 64 MiB physical
# VMEM (smallest of v5e/v6e/v7x).
_VMEM_TILE_BUDGET = 44 << 20
_VMEM_SLACK = 2 << 20
# Target bytes of OUTPUT rows moved per grid step (~8 MiB amortizes the ~0.35us
# per-step overhead to <10% even at 3.2 TB/s HBM).
_TILE_TARGET_BYTES = 8 << 20


def _cls_token_kernel(x_ref, cls_ref, o_ref):
    # x_ref:   (BB, T*D)       flattened tokens for BB batch rows
    # cls_ref: (BB, D)         pre-broadcast [CLS] slab (grid-invariant input)
    # o_ref:   (BB, (T+1)*D)
    xd = x_ref.shape[1]  # T*D (static)
    # Bulk copy: one wide, lane-dense store.
    o_ref[:, :xd] = x_ref[...]
    # Append the [CLS] token as the last D columns of every row (pure store;
    # the broadcast was done once in the wrapper, not per grid step).
    o_ref[:, xd:] = cls_ref[...]


def _sublane(itemsize: int) -> int:
    # Second-minor tiling multiple: 8 for 4-byte, 16 for 2-byte, 32 for 1-byte dtypes.
    return 8 * max(1, 4 // itemsize)


def _round_to_sublane(bb: int, B: int, sublane: int) -> int:
    """Make bb a legal second-minor block size: a multiple of `sublane` or == B."""
    bb = max(1, min(bb, B))
    if bb >= B:
        return B
    if bb >= sublane:
        return (bb // sublane) * sublane
    return min(B, sublane)


def cls_token_forward(x: jax.Array, weight: jax.Array, block_batch=None) -> jax.Array:
    """x: (B, T, D), weight: (D,) -> (B, T+1, D) with weight appended as the last token."""
    B, T, D = x.shape
    assert weight.shape == (D,)

    itemsize = jnp.dtype(x.dtype).itemsize
    in_cols = T * D
    out_cols = (T + 1) * D
    sublane = _sublane(itemsize)

    # Bytes per batch row across all double-buffered tiles (input + output + CLS slab).
    per_row = 2 * (in_cols + out_cols + D) * itemsize
    bb_vmem_cap = max(1, (_VMEM_TILE_BUDGET - _VMEM_SLACK) // per_row)

    if block_batch is not None:
        # Validate a user-supplied block size: clamp to the VMEM budget and round to
        # the dtype sublane multiple (clamp the tile, never the VMEM limit).
        bb = _round_to_sublane(min(int(block_batch), bb_vmem_cap), B, sublane)
    else:
        bb = max(1, _TILE_TARGET_BYTES // max(out_cols * itemsize, 1))
        bb = min(bb, bb_vmem_cap)
        # Guarantee >= 2 grid steps whenever possible so both v7x TensorCores get
        # work (neutral on single-core v5e/v6e).
        if B > sublane:
            half = -(-B // 2)                       # cdiv(B, 2)
            half_up = sublane * (-(-half // sublane))
            bb = min(bb, half_up)
        bb = _round_to_sublane(bb, B, sublane)

    grid = (pl.cdiv(B, bb),)

    w2d = weight.astype(x.dtype).reshape(1, D)      # cast once in the wrapper
    cls_slab = jnp.broadcast_to(w2d, (bb, D))       # precomputed [CLS] slab
    x2d = x.reshape(B, in_cols)                     # layout plumbing -> lane-dense stores

    # VMEM limit follows from the (already budget-clamped) tile sizes.
    vmem_need = bb * per_row + _VMEM_SLACK
    vmem_limit = int(max(vmem_need, 8 << 20))

    out2d = pl.pallas_call(
        _cls_token_kernel,
        out_shape=jax.ShapeDtypeStruct((B, out_cols), x.dtype),
        grid_spec=pltpu.PrefetchScalarGridSpec(
            num_scalar_prefetch=0,
            grid=grid,
            in_specs=[
                pl.BlockSpec((bb, in_cols), lambda i: (i, 0)),
                pl.BlockSpec((bb, D), lambda i: (0, 0)),   # grid-invariant CLS slab
            ],
            out_specs=pl.BlockSpec((bb, out_cols), lambda i: (i, 0)),
        ),
        compiler_params=pltpu.CompilerParams(
            dimension_semantics=("parallel",),
            vmem_limit_bytes=vmem_limit,
        ),
    )(x2d, cls_slab)

    return out2d.reshape(B, T + 1, D)


def init_cls_weight(key: jax.Array, d_token: int, initialization: str = "uniform") -> jax.Array:
    """Deterministic re-implementation of _TokenInitialization.apply."""
    s = 1.0 / math.sqrt(d_token)
    if initialization == "uniform":
        return jax.random.uniform(key, (d_token,), minval=-s, maxval=s, dtype=jnp.float32)
    elif initialization == "normal":
        return jax.random.normal(key, (d_token,), dtype=jnp.float32) * s
    else:
        raise ValueError("initialization must be one of ['uniform', 'normal']")


def _reference(x, weight):
    B, _, D = x.shape
    w = weight.astype(x.dtype).reshape(1, 1, D)
    return jnp.concatenate([x, jnp.broadcast_to(w, (B, 1, D))], axis=1)


if __name__ == "__main__":
    key = jax.random.PRNGKey(0)
    k_x, k_w, k_x2, k_x3, k_x4 = jax.random.split(key, 5)

    # Small case matching the PyTorch example shapes.
    B, T, D = 2, 8, 32
    x = jax.random.normal(k_x, (B, T, D), dtype=jnp.float32)
    weight = init_cls_weight(k_w, D, "uniform")

    out = jax.block_until_ready(cls_token_forward(x, weight))
    assert out.shape == (B, T + 1, D)
    assert jnp.allclose(out, _reference(x, weight)), "mismatch vs reference (small case)"

    # Multi-block batch-tiled grid (forced block size of 8 rows -> 3 grid steps).
    B2 = 24
    x2 = jax.random.normal(k_x2, (B2, T, D), dtype=jnp.float32)
    out2 = jax.block_until_ready(cls_token_forward(x2, weight, block_batch=8))
    assert out2.shape == (B2, T + 1, D)
    assert jnp.allclose(out2, _reference(x2, weight)), "mismatch vs reference (batch-blocked)"

    # Auto-sizing with B not a multiple of the block: >=2 grid steps + partial last block.
    B3 = 20
    x3 = jax.random.normal(k_x3, (B3, T, D), dtype=jnp.float32)
    out3 = jax.block_until_ready(cls_token_forward(x3, weight))
    assert out3.shape == (B3, T + 1, D)
    assert jnp.allclose(out3, _reference(x3, weight)), "mismatch vs reference (partial block)"

    # bfloat16 input with an illegal user block size (8 < bf16 sublane multiple 16):
    # the wrapper rounds it to 16; weight is cast to x.dtype in the wrapper.
    B4 = 32
    x4 = jax.random.normal(k_x4, (B4, T, D), dtype=jnp.bfloat16)
    out4 = jax.block_until_ready(cls_token_forward(x4, weight, block_batch=8))
    assert out4.dtype == jnp.bfloat16
    assert out4.shape == (B4, T + 1, D)
    assert jnp.allclose(out4, _reference(x4, weight)), "mismatch vs reference (bf16)"

    print("KERNEL_OK")
</pallas_src>

<mosaic_0001>
module attributes {stable_mosaic.version = 11 : i64} {
  func.func @_cls_token_kernel(%arg0: i32, %arg1: memref<2x256xf32, #tpu.memory_space<vmem>>, %arg2: memref<2x32xf32, #tpu.memory_space<vmem>>, %arg3: memref<2x288xf32, #tpu.memory_space<vmem>>) attributes {dimension_semantics = [#tpu.dimension_semantics<parallel>], iteration_bounds = array<i64: 1>, scalar_prefetch = 0 : i64, scratch_operands = 0 : i64, tpu.core_type = #tpu.core_type<tc>, window_params = [{transform_indices = @transform_0, window_bounds = array<i64: 2, 256>}, {pipeline_mode = #tpu.pipeline_mode<synchronous>, transform_indices = @transform_1, window_bounds = array<i64: 2, 32>}, {transform_indices = @transform_2, window_bounds = array<i64: 2, 288>}]} {
    %c0 = arith.constant 0 : index
    %c0_0 = arith.constant 0 : index
    %0 = vector.load %arg1[%c0, %c0_0] : memref<2x256xf32, #tpu.memory_space<vmem>>, vector<2x256xf32>
    %c0_1 = arith.constant 0 : index
    %c0_2 = arith.constant 0 : index
    %1 = vector.load %arg3[%c0_1, %c0_2] : memref<2x288xf32, #tpu.memory_space<vmem>>, vector<2x256xf32>
    tpu.vector_store %arg3[%c0_1, %c0_2], %0 {strides = array<i32>} : memref<2x288xf32, #tpu.memory_space<vmem>>, vector<2x256xf32>,
    %c0_3 = arith.constant 0 : index
    %c0_4 = arith.constant 0 : index
    %2 = vector.load %arg2[%c0_3, %c0_4] : memref<2x32xf32, #tpu.memory_space<vmem>>, vector<2x32xf32>
    %c0_5 = arith.constant 0 : index
    %c256 = arith.constant 256 : index
    %3 = vector.load %arg3[%c0_5, %c256] : memref<2x288xf32, #tpu.memory_space<vmem>>, vector<2x32xf32>
    tpu.vector_store %arg3[%c0_5, %c256], %2 {strides = array<i32>} : memref<2x288xf32, #tpu.memory_space<vmem>>, vector<2x32xf32>,
    return
  }
  func.func @transform_0(%arg0: i32) -> (i32, i32) {
    %c0_i32 = arith.constant 0 : i32
    %c0_i32_0 = arith.constant 0 : i32
    return %arg0, %c0_i32 : i32, i32
  }
  func.func @transform_1(%arg0: i32) -> (i32, i32) {
    %c0_i32 = arith.constant 0 : i32
    %c0_i32_0 = arith.constant 0 : i32
    %c0_i32_1 = arith.constant 0 : i32
    return %c0_i32, %c0_i32_0 : i32, i32
  }
  func.func @transform_2(%arg0: i32) -> (i32, i32) {
    %c0_i32 = arith.constant 0 : i32
    %c0_i32_0 = arith.constant 0 : i32
    return %arg0, %c0_i32 : i32, i32
  }
}

</mosaic_0001>

<bundles_post_ra>
// kernel: tpu_custom_call.1
= control target key start
LH: loop header
LB: loop body
LE: loop exit
PB: predicated region body
PF: predicated region fallthrough
CT: control target
= control target key end

     0   :  { %7 = vsyncpa [#allocation3], 0  ;;  %s171_s0 = inlined_call_operand.hbm [shape: f32[2,256], index: 0, kind: input, shape index: {}]   ;;  %s172_s1 = inlined_call_operand.hbm [shape: f32[2,32], index: 1, kind: input, shape index: {}]   ;;  %s173_s2 = inlined_call_operand.hbm [shape: f32[2,288], index: 2, kind: output, shape index: {}]  }
   0x1   :  { %8 = vsyncpa [#allocation6], 0 }
   0x2   :  { %9 = vsyncpa [#allocation4], 0  ;;  %s15_s11 = sshll.u32 %s171_s0, 4  ;;  %s144_s12 = smov [#allocation2]   ;;  %s16_s11 = int_to_ptr.hbm [resolvable:$true] %s15_s11 }
   0x3   :  { %s17_s13 = sshll.u32 %s144_s12, 4  ;;  %s26_s16 = sshll.u32 %s172_s1, 4  ;;  %s18_s13 = int_to_ptr.vmem [resolvable:$true] %s17_s13  ;;  %s27_s16 = int_to_ptr.hbm [resolvable:$true] %s26_s16 }
   0x4   :  { %20 = dma.hbm_to_vmem [thread:$0]  %s16_s11, 64, %s18_s13, [#allocation3]  }
   0x5   :  { %s145_s17 = smov [#allocation5]  }
   0x6   :  { %s28_s18 = sshll.u32 %s145_s17, 4  ;;  %s29_s18 = int_to_ptr.vmem [resolvable:$true] %s28_s18 }
   0x7   :  { %31 = dma.hbm_to_vmem [thread:$0]  %s27_s16, 32, %s29_s18, [#allocation6]  }
   0x8   :  { %138 = dma.done.wait [#allocation3], 64  }
   0x9   :  { %139 = vsyncadd [#allocation3], 4294967232 }
   0xa   :  { %140 = dma.done.wait [#allocation6], 32  }
   0xb   :  { %141 = vsyncadd [#allocation6], 4294967264  ;;  %s146_s19 = smov [#allocation7]   ;;  %s52_s22 = sshll.u32 %s173_s2, 4  ;;  %vm43_vm0 = vcmask 254976   ;;  %s53_s22 = int_to_ptr.hbm [resolvable:$true] %s52_s22 }
   0xc   :  { %s50_s0 = sshll.u32 %s146_s19, 4  ;;  %v40_v0 = vld [vmem:[#allocation2] sm:$0xf]  ;;  %v42_v1 = vld [vmem:[#allocation5] sm:$0x3]  ;;  %s51_s0 = int_to_ptr.vmem [resolvable:$true] %s50_s0 }
   0xd   :  { %41 = vst [vmem:[#allocation7] sm:$0xf] %v40_v0 }
   0xe   :  { %44 = vst.msk [vmem:[#allocation7 + $0x4] sm:$0x3] %vm43_vm0, %v42_v1 }
   0xf   :  { %55 = dma.vmem_to_hbm [thread:$0]  %s51_s0, 96, %s53_s22, [#allocation4]  }
  0x10   :  { %142 = dma.done.wait [#allocation4], 96  }
  0x11   :  { %143 = vsyncadd [#allocation4], 4294967200 }
  0x12   :  { %60 = vsyncpa [#allocation3], 1 }
  0x13   :  { %61 = vsyncpa [#allocation6], 1 }
  0x14   :  { %62 = vsyncpa [#allocation4], 1 }

</bundles_post_ra>
